<compile_context>
chip_gen: v7x
topology: tpu7x:2x2x1
jax: 0.10.0
libtpu: 0.0.40
codegen_flags: <defaults>
</compile_context>

<pallas_src>
import functools

import jax
import jax.numpy as jnp
from jax.experimental import pallas as pl
from jax.experimental.pallas import tpu as pltpu


LANE = 128  # logits padded to one full lane-width for unmasked stores


def _round_up(n: int, m: int) -> int:
    return ((n + m - 1) // m) * m


def _cdiv(a: int, b: int) -> int:
    return -(-a // b)


def mlp_kernel(x_ref, w1_ref, b1_ref, w2_ref, b2_ref, w3_ref, b3_ref, o_ref):
    # x arrives in f32 from HBM; cast to bf16 on the VPU (free under the
    # memory-bound regime), feed the MXU with f32 accumulation.
    x = x_ref[...].astype(jnp.bfloat16)

    # Layer 1: Linear + bias + ReLU (bias/ReLU in f32)
    h1 = jnp.dot(x, w1_ref[...], preferred_element_type=jnp.float32)
    h1 = jnp.maximum(h1 + b1_ref[...], 0.0)

    # Layer 2: Linear + bias + ReLU
    h2 = jnp.dot(h1.astype(jnp.bfloat16), w2_ref[...],
                 preferred_element_type=jnp.float32)
    h2 = jnp.maximum(h2 + b2_ref[...], 0.0)

    # Layer 3: Linear (logits, lane-dense padded to 128 cols, stored as bf16)
    out = jnp.dot(h2.astype(jnp.bfloat16), w3_ref[...],
                  preferred_element_type=jnp.float32)
    o_ref[...] = (out + b3_ref[...]).astype(o_ref.dtype)


@functools.partial(jax.jit, static_argnames=("batch_tile",))
def fashion_mnist_model_v1(x_nchw, params, *, batch_tile: int = 1024):
    """Forward pass. x_nchw: [B, C, H, W] float32. params: dict of f32 weights."""
    B = x_nchw.shape[0]
    xf = x_nchw.reshape(B, -1)                     # nn.Flatten()
    F = xf.shape[1]

    w1, b1 = params["w1"], params["b1"]
    w2, b2 = params["w2"], params["b2"]
    w3, b3 = params["w3"], params["b3"]
    hidden = w1.shape[1]
    out_features = w3.shape[1]
    out_pad = _round_up(out_features, LANE)        # lane-dense logits

    # Batch tiling.  Small batches use a single full-extent block (no padding
    # at all); large batches pick TB (multiple of 8, <= batch_tile) so that
    # padding waste stays below 8 rows per tile.  For v7x dual-TC sharding the
    # grid naturally has >= 2 steps whenever B > batch_tile.
    if B <= batch_tile:
        num_tiles, TB = 1, B                       # full-extent block dim
    else:
        num_tiles = _cdiv(B, batch_tile)
        TB = _round_up(_cdiv(B, num_tiles), 8)
    B_pad = num_tiles * TB

    if B_pad != B:
        # Only pads the ragged tail (< 8*num_tiles rows); pick B % TB == 0 to
        # skip this pass entirely in hot paths.
        xf = jnp.pad(xf, ((0, B_pad - B), (0, 0)))

    # Weights/biases: tiny, VMEM-resident.  bf16 matmul operands; biases f32.
    w1_bf = w1.astype(jnp.bfloat16)
    w2_bf = w2.astype(jnp.bfloat16)
    w3_bf = jnp.pad(w3, ((0, 0), (0, out_pad - out_features))).astype(jnp.bfloat16)
    b3_p = jnp.pad(b3, ((0, 0), (0, out_pad - out_features)))

    resident = lambda shape: pl.BlockSpec(shape, lambda i: (0,) * len(shape))

    weight_bytes = (F * hidden + hidden * hidden + hidden * out_pad) * 2 \
        + (2 * hidden + out_pad) * 4
    cost = pl.CostEstimate(
        flops=2 * B_pad * (F * hidden + hidden * hidden + hidden * out_pad),
        transcendentals=0,
        bytes_accessed=B_pad * (F * 4 + out_pad * 2) + weight_bytes,
    )

    out_padded = pl.pallas_call(
        mlp_kernel,
        out_shape=jax.ShapeDtypeStruct((B_pad, out_pad), jnp.bfloat16),
        grid=(num_tiles,),
        in_specs=[
            pl.BlockSpec((TB, F), lambda i: (i, 0)),       # streamed f32 x tile
            resident(w1_bf.shape), resident(b1.shape),     # weights stay in VMEM
            resident(w2_bf.shape), resident(b2.shape),
            resident(w3_bf.shape), resident(b3_p.shape),
        ],
        out_specs=pl.BlockSpec((TB, out_pad), lambda i: (i, 0)),
        compiler_params=pltpu.CompilerParams(
            dimension_semantics=("parallel",),   # v7x: shard batch over 2 TCs
            vmem_limit_bytes=32 * 1024 * 1024,   # covers TB~2048 f32 x on v5e too
        ),
        cost_estimate=cost,
    )(xf, w1_bf, b1, w2_bf, b2, w3_bf, b3_p)

    return out_padded[:B, :out_features].astype(jnp.float32)


def init_params(key, input_features, hidden_units, output_features):
    """Deterministic init mimicking PyTorch nn.Linear default (U[-1/sqrt(fan_in), +])."""
    ks = jax.random.split(key, 6)

    def linear(kw, kb, fan_in, fan_out):
        bound = 1.0 / jnp.sqrt(fan_in)
        w = jax.random.uniform(kw, (fan_in, fan_out), jnp.float32, -bound, bound)
        b = jax.random.uniform(kb, (1, fan_out), jnp.float32, -bound, bound)
        return w, b

    w1, b1 = linear(ks[0], ks[1], input_features, hidden_units)
    w2, b2 = linear(ks[2], ks[3], hidden_units, hidden_units)
    w3, b3 = linear(ks[4], ks[5], hidden_units, output_features)
    return {"w1": w1, "b1": b1, "w2": w2, "b2": b2, "w3": w3, "b3": b3}


if __name__ == "__main__":
    key = jax.random.PRNGKey(0)
    k_x, k_p = jax.random.split(key)

    # Small, module-consistent shapes (real FashionMNIST geometry: 1x28x28).
    B, C, H, W = 2, 1, 28, 28
    input_features = C * H * W        # 784 (not a multiple of 128 -> full-extent block dim)
    hidden_units = 32
    output_features = 10

    x = jax.random.normal(k_x, (B, C, H, W), dtype=jnp.float32)
    params = init_params(k_p, input_features, hidden_units, output_features)

    out = fashion_mnist_model_v1(x, params)
    jax.block_until_ready(out)
    assert out.shape == (B, output_features)

    # Reference with matching bf16 operand casts, f32 accumulation and a final
    # bf16 logits round-trip (matches the kernel's numerics).
    xf = x.reshape(B, -1).astype(jnp.bfloat16)
    w1b = params["w1"].astype(jnp.bfloat16)
    w2b = params["w2"].astype(jnp.bfloat16)
    w3b = params["w3"].astype(jnp.bfloat16)
    r1 = jnp.maximum(jnp.dot(xf, w1b, preferred_element_type=jnp.float32) + params["b1"], 0.0)
    r2 = jnp.maximum(jnp.dot(r1.astype(jnp.bfloat16), w2b,
                             preferred_element_type=jnp.float32) + params["b2"], 0.0)
    ref_bf16 = (jnp.dot(r2.astype(jnp.bfloat16), w3b,
                        preferred_element_type=jnp.float32) + params["b3"])
    ref_bf16 = ref_bf16.astype(jnp.bfloat16).astype(jnp.float32)
    assert jnp.allclose(out, ref_bf16, atol=1e-2, rtol=1e-2), "mismatch vs bf16-consistent reference"

    # Pure-f32 reference (module semantics) — loose tolerance for the bf16 casts.
    xf32 = x.reshape(B, -1)
    f1 = jnp.maximum(xf32 @ params["w1"] + params["b1"], 0.0)
    f2 = jnp.maximum(f1 @ params["w2"] + params["b2"], 0.0)
    ref_f32 = f2 @ params["w3"] + params["b3"]
    assert jnp.allclose(out, ref_f32, atol=1e-1, rtol=5e-2), "mismatch vs f32 reference"

    print("KERNEL_OK")
</pallas_src>

<mosaic_0001>
module attributes {stable_mosaic.version = 11 : i64} {
  func.func @mlp_kernel(%arg0: i32, %arg1: memref<2x784xf32, #tpu.memory_space<vmem>>, %arg2: memref<784x32xbf16, #tpu.memory_space<vmem>>, %arg3: memref<1x32xf32, #tpu.memory_space<vmem>>, %arg4: memref<32x32xbf16, #tpu.memory_space<vmem>>, %arg5: memref<1x32xf32, #tpu.memory_space<vmem>>, %arg6: memref<32x128xbf16, #tpu.memory_space<vmem>>, %arg7: memref<1x128xf32, #tpu.memory_space<vmem>>, %arg8: memref<2x128xbf16, #tpu.memory_space<vmem>>) attributes {dimension_semantics = [#tpu.dimension_semantics<parallel>], iteration_bounds = array<i64: 1>, scalar_prefetch = 0 : i64, scratch_operands = 0 : i64, tpu.core_type = #tpu.core_type<tc>, window_params = [{transform_indices = @transform_0, window_bounds = array<i64: 2, 784>}, {pipeline_mode = #tpu.pipeline_mode<synchronous>, transform_indices = @transform_1, window_bounds = array<i64: 784, 32>}, {pipeline_mode = #tpu.pipeline_mode<synchronous>, transform_indices = @transform_2, window_bounds = array<i64: 1, 32>}, {pipeline_mode = #tpu.pipeline_mode<synchronous>, transform_indices = @transform_3, window_bounds = array<i64: 32, 32>}, {pipeline_mode = #tpu.pipeline_mode<synchronous>, transform_indices = @transform_4, window_bounds = array<i64: 1, 32>}, {pipeline_mode = #tpu.pipeline_mode<synchronous>, transform_indices = @transform_5, window_bounds = array<i64: 32, 128>}, {pipeline_mode = #tpu.pipeline_mode<synchronous>, transform_indices = @transform_6, window_bounds = array<i64: 1, 128>}, {transform_indices = @transform_7, window_bounds = array<i64: 2, 128>}]} {
    %c0 = arith.constant 0 : index
    %c0_0 = arith.constant 0 : index
    %0 = vector.load %arg1[%c0, %c0_0] : memref<2x784xf32, #tpu.memory_space<vmem>>, vector<2x784xf32>
    %1 = arith.truncf %0 : vector<2x784xf32> to vector<2x784xbf16>
    %c0_1 = arith.constant 0 : index
    %c0_2 = arith.constant 0 : index
    %2 = vector.load %arg2[%c0_1, %c0_2] : memref<784x32xbf16, #tpu.memory_space<vmem>>, vector<784x32xbf16>
    %cst = arith.constant dense<0.000000e+00> : vector<2x32xf32>
    %3 = tpu.matmul %1, %2, %cst {dimension_numbers = #tpu.dot_dimension_numbers<[1], [0], [0], [1], [0, 0, 1, 1], [], []>} : vector<2x784xbf16>, vector<784x32xbf16>, vector<2x32xf32> -> vector<2x32xf32>
    %c0_3 = arith.constant 0 : index
    %c0_4 = arith.constant 0 : index
    %4 = vector.load %arg3[%c0_3, %c0_4] : memref<1x32xf32, #tpu.memory_space<vmem>>, vector<1x32xf32>
    %5 = vector.broadcast %4 : vector<1x32xf32> to vector<2x32xf32>
    %6 = arith.addf %3, %5 : vector<2x32xf32>
    %cst_5 = arith.constant 0.000000e+00 : f32
    %7 = vector.broadcast %cst_5 : f32 to vector<2x32xf32>
    %8 = arith.maximumf %6, %7 : vector<2x32xf32>
    %9 = arith.truncf %8 : vector<2x32xf32> to vector<2x32xbf16>
    %c0_6 = arith.constant 0 : index
    %c0_7 = arith.constant 0 : index
    %10 = vector.load %arg4[%c0_6, %c0_7] : memref<32x32xbf16, #tpu.memory_space<vmem>>, vector<32x32xbf16>
    %cst_8 = arith.constant dense<0.000000e+00> : vector<2x32xf32>
    %11 = tpu.matmul %9, %10, %cst_8 {dimension_numbers = #tpu.dot_dimension_numbers<[1], [0], [0], [1], [0, 0, 1, 1], [], []>} : vector<2x32xbf16>, vector<32x32xbf16>, vector<2x32xf32> -> vector<2x32xf32>
    %c0_9 = arith.constant 0 : index
    %c0_10 = arith.constant 0 : index
    %12 = vector.load %arg5[%c0_9, %c0_10] : memref<1x32xf32, #tpu.memory_space<vmem>>, vector<1x32xf32>
    %13 = vector.broadcast %12 : vector<1x32xf32> to vector<2x32xf32>
    %14 = arith.addf %11, %13 : vector<2x32xf32>
    %cst_11 = arith.constant 0.000000e+00 : f32
    %15 = vector.broadcast %cst_11 : f32 to vector<2x32xf32>
    %16 = arith.maximumf %14, %15 : vector<2x32xf32>
    %17 = arith.truncf %16 : vector<2x32xf32> to vector<2x32xbf16>
    %c0_12 = arith.constant 0 : index
    %c0_13 = arith.constant 0 : index
    %18 = vector.load %arg6[%c0_12, %c0_13] : memref<32x128xbf16, #tpu.memory_space<vmem>>, vector<32x128xbf16>
    %cst_14 = arith.constant dense<0.000000e+00> : vector<2x128xf32>
    %19 = tpu.matmul %17, %18, %cst_14 {dimension_numbers = #tpu.dot_dimension_numbers<[1], [0], [0], [1], [0, 0, 1, 1], [], []>} : vector<2x32xbf16>, vector<32x128xbf16>, vector<2x128xf32> -> vector<2x128xf32>
    %c0_15 = arith.constant 0 : index
    %c0_16 = arith.constant 0 : index
    %20 = vector.load %arg7[%c0_15, %c0_16] : memref<1x128xf32, #tpu.memory_space<vmem>>, vector<1x128xf32>
    %21 = vector.broadcast %20 : vector<1x128xf32> to vector<2x128xf32>
    %22 = arith.addf %19, %21 : vector<2x128xf32>
    %23 = arith.truncf %22 : vector<2x128xf32> to vector<2x128xbf16>
    %c0_17 = arith.constant 0 : index
    %c0_18 = arith.constant 0 : index
    %24 = vector.load %arg8[%c0_17, %c0_18] : memref<2x128xbf16, #tpu.memory_space<vmem>>, vector<2x128xbf16>
    tpu.vector_store %arg8[%c0_17, %c0_18], %23 {strides = array<i32>} : memref<2x128xbf16, #tpu.memory_space<vmem>>, vector<2x128xbf16>,
    return
  }
  func.func @transform_0(%arg0: i32) -> (i32, i32) {
    %c0_i32 = arith.constant 0 : i32
    %c0_i32_0 = arith.constant 0 : i32
    return %arg0, %c0_i32 : i32, i32
  }
  func.func @transform_1(%arg0: i32) -> (i32, i32) {
    %c0_i32 = arith.constant 0 : i32
    %c0_i32_0 = arith.constant 0 : i32
    %c0_i32_1 = arith.constant 0 : i32
    return %c0_i32, %c0_i32_0 : i32, i32
  }
  func.func @transform_2(%arg0: i32) -> (i32, i32) {
    %c0_i32 = arith.constant 0 : i32
    %c0_i32_0 = arith.constant 0 : i32
    %c0_i32_1 = arith.constant 0 : i32
    return %c0_i32, %c0_i32_0 : i32, i32
  }
  func.func @transform_3(%arg0: i32) -> (i32, i32) {
    %c0_i32 = arith.constant 0 : i32
    %c0_i32_0 = arith.constant 0 : i32
    %c0_i32_1 = arith.constant 0 : i32
    return %c0_i32, %c0_i32_0 : i32, i32
  }
  func.func @transform_4(%arg0: i32) -> (i32, i32) {
    %c0_i32 = arith.constant 0 : i32
    %c0_i32_0 = arith.constant 0 : i32
    %c0_i32_1 = arith.constant 0 : i32
    return %c0_i32, %c0_i32_0 : i32, i32
  }
  func.func @transform_5(%arg0: i32) -> (i32, i32) {
    %c0_i32 = arith.constant 0 : i32
    %c0_i32_0 = arith.constant 0 : i32
    %c0_i32_1 = arith.constant 0 : i32
    return %c0_i32, %c0_i32_0 : i32, i32
  }
  func.func @transform_6(%arg0: i32) -> (i32, i32) {
    %c0_i32 = arith.constant 0 : i32
    %c0_i32_0 = arith.constant 0 : i32
    %c0_i32_1 = arith.constant 0 : i32
    return %c0_i32, %c0_i32_0 : i32, i32
  }
  func.func @transform_7(%arg0: i32) -> (i32, i32) {
    %c0_i32 = arith.constant 0 : i32
    %c0_i32_0 = arith.constant 0 : i32
    return %arg0, %c0_i32 : i32, i32
  }
}

</mosaic_0001>

<bundles_post_ra>
// kernel: fashion_mnist_model_v1.1
= control target key start
LH: loop header
LB: loop body
LE: loop exit
PB: predicated region body
PF: predicated region fallthrough
CT: control target
= control target key end

     0   :  { %v997_v21 = vmov 1983009808   ;;  %v35_v23 = vlaneseq  ;;  %v998_v47 = vmov 0.0   ;;  %vm999_vm0 = vmmov 0   ;;  %s1230_s1 = inlined_call_operand.vmem [shape: bf16[784,32], index: 1, kind: input, shape index: {}]   ;;  %s1231_s0 = inlined_call_operand.vmem [shape: f32[2,784], index: 0, kind: input, shape index: {}]   ;;  %s1232_s3 = inlined_call_operand.vmem [shape: bf16[32,32], index: 3, kind: input, shape index: {}]   ;;  %s1233_s5 = inlined_call_operand.vmem [shape: bf16[32,128], index: 5, kind: input, shape index: {}]   ;;  %s1234_s2 = inlined_call_operand.vmem [shape: f32[1,32], index: 2, kind: input, shape index: {}]   ;;  %s1235_s4 = inlined_call_operand.vmem [shape: f32[1,32], index: 4, kind: input, shape index: {}]   ;;  %s1236_s6 = inlined_call_operand.vmem [shape: f32[1,128], index: 6, kind: input, shape index: {}]   ;;  %s1237_s7 = inlined_call_operand.vmem [shape: bf16[2,128], index: 7, kind: output, shape index: {}]  }
   0x1   :  { %v942_v0 = vld [vmem:[%s1230_s1 + $0x40] sm:$0xff]   ;;  %v946_v4 = vld [vmem:[%s1230_s1 + $0x48] sm:$0xff]   ;;  %v950_v8 = vld [vmem:[%s1230_s1 + $0x50] sm:$0xff]   ;;  %v33_v22 = vunpack.c.l.s4 %v997_v21  ;;  %vm477_vm1 = vcmask 130048   ;;  %vm666_vm2 = vcmask 261120  }
   0x2   :  { %v943_v1 = vld [vmem:[%s1230_s1] sm:$0xff]   ;;  %843 = vmatprep.subr.bf16.mxu0 %v942_v0  ;;  %v947_v5 = vld [vmem:[%s1230_s1 + $0x8] sm:$0xff]   ;;  %v951_v9 = vld [vmem:[%s1230_s1 + $0x10] sm:$0xff]   ;;  %v36_v29 = vshrl.u32 %v35_v23, 7 }
   0x3   :  { %v944_v2 = vld [vmem:[%s1230_s1 + $0xc0] sm:$0xff]   ;;  %844 = vmatpush3.bf16.msra.mxu0 %v943_v1  ;;  %v948_v6 = vld [vmem:[%s1230_s1 + $0xc8] sm:$0xff]   ;;  %v952_v10 = vld [vmem:[%s1230_s1 + $0xd0] sm:$0xff]   ;;  %v34_v28 = vunpack.c.0.s8 %v33_v22 }
   0x4   :  { %v945_v3 = vld [vmem:[%s1230_s1 + $0x80] sm:$0xff]   ;;  %865 = vmatprep.subr.bf16.mxu1 %v944_v2  ;;  %845 = vmatprep.subr.bf16.mxu0 %v946_v4  ;;  %v949_v7 = vld [vmem:[%s1230_s1 + $0x88] sm:$0xff]   ;;  %v953_v11 = vld [vmem:[%s1230_s1 + $0x90] sm:$0xff]  }
   0x5   :  { %866 = vmatpush3.bf16.msra.mxu1 %v945_v3  ;;  %v954_v12 = vld [vmem:[%s1230_s1 + $0x58] sm:$0xff]   ;;  %v958_v16 = vld [vmem:[%s1230_s1 + $0x60] sm:$0xff]   ;;  %v962_v20 = vld [vmem:[%s1230_s1 + $0x68] sm:$0xff]   ;;  %v37_v34 = vsub.s32 %v34_v28, %v36_v29 }
   0x6   :  { %867 = vmatprep.subr.bf16.mxu1 %v948_v6  ;;  %v955_v13 = vld [vmem:[%s1230_s1 + $0x18] sm:$0xff]   ;;  %v959_v17 = vld [vmem:[%s1230_s1 + $0x20] sm:$0xff]   ;;  %v963_v24 = vld [vmem:[%s1230_s1 + $0x28] sm:$0xff]  }
   0x7   :  { %846 = vmatpush3.bf16.msra.mxu0 %v947_v5  ;;  %v956_v14 = vld [vmem:[%s1230_s1 + $0xd8] sm:$0xff]   ;;  %v960_v18 = vld [vmem:[%s1230_s1 + $0xe0] sm:$0xff]   ;;  %v964_v25 = vld [vmem:[%s1230_s1 + $0xe8] sm:$0xff]  }
   0x8   :  { %847 = vmatprep.subr.bf16.mxu0 %v950_v8  ;;  %v957_v15 = vld [vmem:[%s1230_s1 + $0x98] sm:$0xff]   ;;  %v961_v19 = vld [vmem:[%s1230_s1 + $0xa0] sm:$0xff]   ;;  %v965_v26 = vld [vmem:[%s1230_s1 + $0xa8] sm:$0xff]  }
   0x9   :  { %868 = vmatpush3.bf16.msra.mxu1 %v949_v7  ;;  %v966_v27 = vld [vmem:[%s1230_s1 + $0x70] sm:$0xff]   ;;  %v970_v33 = vld [vmem:[%s1230_s1 + $0x78] sm:$0xff]   ;;  %v27_v37 = vld [vmem:[%s1231_s0] sm:$0xff] }
   0xa   :  { %869 = vmatprep.subr.bf16.mxu1 %v952_v10  ;;  %v967_v30 = vld [vmem:[%s1230_s1 + $0x30] sm:$0xff]   ;;  %v971_v35 = vld [vmem:[%s1230_s1 + $0x38] sm:$0xff]   ;;  %v28_v38 = vld [vmem:[%s1231_s0 + $0x8] sm:$0x3f]  ;;  %v38_v39 = vrot.slane %v27_v37, %v37_v34  ;;  %v31_v41 = vcombine.high %v27_v37, %v27_v37 }
   0xb   :  { %848 = vmatpush3.bf16.msra.mxu0 %v951_v9  ;;  %v968_v31 = vld [vmem:[%s1230_s1 + $0xf0] sm:$0xff]   ;;  %v972_v36 = vld [vmem:[%s1230_s1 + $0xf8] sm:$0xff]   ;;  %v55_v42 = vrot.slane %v28_v38, %v37_v34  ;;  %v975_v43 = vld [vmem:[%s1230_s1 + $0x140] sm:$0xff]   ;;  %v48_v58 = vcombine.high %v28_v38, %v28_v38 }
   0xc   :  { %849 = vmatprep.subr.bf16.mxu0 %v954_v12  ;;  %v969_v32 = vld [vmem:[%s1230_s1 + $0xb0] sm:$0xff]   ;;  %v974_v40 = vld [vmem:[%s1230_s1 + $0xb8] sm:$0xff]   ;;  %v46_v44 = vcombine.high %v38_v39, %v38_v39  ;;  %v45_v45 = vrot.slane %v31_v41, %v37_v34  ;;  %v71_v46 = vpack.c.bf16 %v38_v39, %v38_v39  ;;  %v977_v51 = vld [vmem:[%s1230_s1 + $0x100] sm:$0xff]  }
   0xd   :  { %870 = vmatpush3.bf16.msra.mxu1 %v953_v11  ;;  %v63_v48 = vcombine.high %v55_v42, %v55_v42  ;;  %v978_v53 = vld [vmem:[%s1230_s1 + $0x148] sm:$0xff]   ;;  %v980_v57 = vld [vmem:[%s1230_s1 + $0x150] sm:$0xff]   ;;  %v982_v60 = vld [vmem:[%s1230_s1 + $0x158] sm:$0xff]   ;;  %v62_v61 = vrot.slane %v48_v58, %v37_v34  ;;  %v75_v9 = vpack.c.bf16 %v55_v42, %v55_v42 }
   0xe   :  { %871 = vmatprep.subr.bf16.mxu1 %v956_v14  ;;  %v72_v49 = vpack.c.bf16 %v46_v44, %v46_v44  ;;  %v47_v50 = vcombine.high %v45_v45, %v45_v45  ;;  %v73_v52 = vpack.c.bf16 %v45_v45, %v45_v45  ;;  %v979_v56 = vld [vmem:[%s1230_s1 + $0x108] sm:$0xff]   ;;  %v981_v59 = vld [vmem:[%s1230_s1 + $0x110] sm:$0xff]   ;;  %v983_v62 = vld [vmem:[%s1230_s1 + $0x118] sm:$0xff]  }
   0xf   :  { %850 = vmatpush3.bf16.msra.mxu0 %v955_v13  ;;  %v76_v55 = vpack.c.bf16 %v63_v48, %v63_v48  ;;  %v984_v63 = vld [vmem:[%s1230_s1 + $0x160] sm:$0xff]   ;;  %v77_v1 = vpack.c.bf16 %v62_v61, %v62_v61  ;;  %v986_v3 = vld [vmem:[%s1230_s1 + $0x168] sm:$0xff]   ;;  %v988_v5 = vld [vmem:[%s1230_s1 + $0x170] sm:$0xff]  }
  0x10   :  { %851 = vmatprep.subr.bf16.mxu0 %v958_v16  ;;  %513 = vmatprep.mubr.bf16.mxu0 %v72_v49  ;;  %v74_v54 = vpack.c.bf16 %v47_v50, %v47_v50  ;;  %v992_v0 = vld [vmem:[%s1230_s1 + $0x180] sm:$0xff]   ;;  %v987_v4 = vld [vmem:[%s1230_s1 + $0x128] sm:$0xff]   ;;  %v989_v6 = vld [vmem:[%s1230_s1 + $0x130] sm:$0xff]  }
  0x11   :  { %872 = vmatpush3.bf16.msra.mxu1 %v957_v15  ;;  %v985_v2 = vld [vmem:[%s1230_s1 + $0x120] sm:$0xff]   ;;  %v990_v7 = vld [vmem:[%s1230_s1 + $0x178] sm:$0xff]   ;;  %v994_v11 = vld [vmem:[%s1232_s3 + $0x8] sm:$0xff]  }
  0x12   :  { %873 = vmatprep.subr.bf16.mxu1 %v960_v18  ;;  %553 = vmatprep.mubr.bf16.mxu1 %v74_v54  ;;  %v991_v8 = vld [vmem:[%s1230_s1 + $0x138] sm:$0xff]   ;;  %v993_v10 = vld [vmem:[%s1232_s3] sm:$0xff]   ;;  %v996_v39 = vld [vmem:[%s1233_s5 + $0x8] sm:$0xff]  }
  0x13   :  { %852 = vmatpush3.bf16.msra.mxu0 %v959_v17  ;;  %v784_v13 = vld [vmem:[%s1234_s2] ss:$0 sm:$0xff] }
  0x14   :  { %853 = vmatprep.subr.bf16.mxu0 %v962_v20  ;;  %v995_v37 = vld [vmem:[%s1233_s5] sm:$0xff]  }
  0x15   :  { %874 = vmatpush3.bf16.msra.mxu1 %v961_v19 }
  0x16   :  { %875 = vmatprep.subr.bf16.mxu1 %v964_v25 }
  0x17   :  { %854 = vmatpush3.bf16.msra.mxu0 %v963_v24 }
  0x18   :  { %855 = vmatprep.subr.bf16.mxu0 %v966_v27 }
  0x19   :  { %876 = vmatpush3.bf16.msra.mxu1 %v965_v26 }
  0x1a   :  { %877 = vmatprep.subr.bf16.mxu1 %v968_v31 }
  0x1b   :  { %856 = vmatpush3.bf16.msra.mxu0 %v967_v30 }
  0x1c   :  { %857 = vmatprep.subr.bf16.mxu0 %v970_v33 }
  0x1d   :  { %878 = vmatpush3.bf16.msra.mxu1 %v969_v32 }
  0x1e   :  { %879 = vmatprep.subr.bf16.mxu1 %v972_v36 }
  0x1f   :  { %858 = vmatpush3.bf16.msra.mxu0 %v971_v35 }
  0x20   :  { %887 = vmatprep.subr.bf16.mxu0 %v975_v43 }
  0x21   :  { %880 = vmatpush3.bf16.msra.mxu1 %v974_v40  ;;  %v835_v40 = vld [vmem:[%s1235_s4] ss:$0 sm:$0xff] }
  0x22   :  { %917 = vmatprep.subr.bf16.mxu1 %v998_v47  ;;  %514 = vmatmul.mubr.bf16.vlgmr.msra.gmra.mrb[0].mxu0 %v71_v46 }
  0x23   :  { %888 = vmatpush3.bf16.msra.mxu0 %v977_v51  ;;  %593 = vmatprep.mubr.bf16.mxu0 %v76_v55 }
  0x24   :  { %554 = vmatmul.mubr.bf16.vlgmr.msra.gmra.mrb[0].mxu1 %v73_v52  ;;  %889 = vmatprep.subr.bf16.mxu0 %v978_v53 }
  0x25   :  { %919 = vmatprep.mubr.msk.bf16.mxu1 %vm999_vm0, %v998_v47  ;;  %918 = vmatpush3.bf16.msra.mxu1 %v992_v0 }
  0x26   :  { %923 = vmatprep.subr.bf16.mxu1 %v998_v47 }
  0x27   :  { %890 = vmatpush3.bf16.msra.mxu0 %v979_v56 }
  0x28   :  { %891 = vmatprep.subr.bf16.mxu0 %v980_v57 }
  0x2b   :  { %892 = vmatpush3.bf16.msra.mxu0 %v981_v59 }
  0x2c   :  { %893 = vmatprep.subr.bf16.mxu0 %v982_v60  ;;  %920 = vmatmul.mubr.msk.bf16.vlgmr.msra.gmra.mrb[4].mxu1 %vm477_vm1, %v77_v1 }
  0x2d   :  { %927 = vmatprep.mubr.msk.bf16.mxu1 %vm999_vm0, %v998_v47  ;;  %924 = vmatpush3.bf16.msra.mxu1 %v993_v10 }
  0x2e   :  { %925 = vmatprep.subr.bf16.mxu1 %v998_v47 }
  0x2f   :  { %894 = vmatpush3.bf16.msra.mxu0 %v983_v62 }
  0x30   :  { %895 = vmatprep.subr.bf16.mxu0 %v984_v63 }
  0x31   :  { %926 = vmatpush3.bf16.msra.mxu1 %v994_v11 }
  0x32   :  { %931 = vmatprep.subr.bf16.mxu1 %v998_v47 }
  0x33   :  { %896 = vmatpush3.bf16.msra.mxu0 %v985_v2 }
  0x34   :  { %897 = vmatprep.subr.bf16.mxu0 %v986_v3 }
  0x37   :  { %898 = vmatpush3.bf16.msra.mxu0 %v987_v4 }
  0x38   :  { %899 = vmatprep.subr.bf16.mxu0 %v988_v5 }
  0x3b   :  { %900 = vmatpush3.bf16.msra.mxu0 %v989_v6 }
  0x3c   :  { %901 = vmatprep.subr.bf16.mxu0 %v990_v7 }
  0x3f   :  { %902 = vmatpush3.bf16.msra.mxu0 %v991_v8 }
  0x42   :  { %594 = vmatmul.mubr.bf16.vlgmr.msra.gmra.mrb[4].mxu0 %v75_v9 }
  0xf5   :  { %v859_v12 = vpop.f32.mrb[0].mxu0 }
  0xf6   :  { %v860_v14 = vpop.f32.mrb[1].mxu0 }
  0xf7   :  { %v861_v15 = vadd.f32 %v860_v14, %v859_v12  ;;  %v862_v16 = vpop.f32.mrb[2].mxu0  ;;  %v881_v17 = vpop.f32.mrb[0].mxu1 }
  0xf8   :  { %v863_v18 = vpop.f32.mrb[3].mxu0  ;;  %v882_v19 = vpop.f32.mrb[1].mxu1 }
  0xf9   :  { %v516_v20 = vadd.f32 %v861_v15, %v784_v13  ;;  %v883_v21 = vadd.f32 %v882_v19, %v881_v17  ;;  %v884_v22 = vpop.f32.mrb[2].mxu1 }
  0xfa   :  { %v885_v23 = vpop.f32.mrb[3].mxu1 }
  0xfb   :  { %v556_v24 = vadd.f32 %v883_v21, %v516_v20 }
  0xff   :  { %v635_v25 = vpop.f32.mrb[4].mxu1 }
 0x100   :  { %v921_v26 = vpop.f32.mrb[5].mxu1 }
 0x101   :  { %v638_v27 = vpop.f32.mrb[6].mxu1 }
 0x102   :  { %v922_v28 = vpop.f32.mrb[7].mxu1 }
 0x115   :  { %v903_v29 = vpop.f32.mrb[4].mxu0 }
 0x116   :  { %v904_v30 = vpop.f32.mrb[5].mxu0 }
 0x117   :  { %v905_v31 = vadd.f32 %v904_v30, %v903_v29  ;;  %v906_v32 = vpop.f32.mrb[6].mxu0 }
 0x118   :  { %v907_v33 = vpop.f32.mrb[7].mxu0 }
 0x119   :  { %v596_v34 = vadd.f32 %v905_v31, %v556_v24 }
 0x11b   :  { %v636_v35 = vadd.f32 %v635_v25, %v596_v34 }
 0x11d   :  { %v641_v36 = vmax.f32 %v636_v35, 0.0 }
 0x11f   :  { %v642_v38 = vpack.c.bf16 %v641_v36, %v641_v36 }
 0x121   :  { %928 = vmatmul.mubr.msk.bf16.vlgmr.msra.gmra.mrb[8].mxu1 %vm666_vm2, %v642_v38 }
 0x122   :  { %932 = vmatpush3.bf16.msra.mxu1 %v995_v37  ;;  %935 = vmatprep.mubr.msk.bf16.mxu1 %vm999_vm0, %v998_v47 }
 0x123   :  { %933 = vmatprep.subr.bf16.mxu1 %v998_v47  ;;  %v839_v47 = vld [vmem:[%s1236_s6] ss:$0 sm:$0xff] }
 0x126   :  { %934 = vmatpush3.bf16.msra.mxu1 %v996_v39 }
 0x1f4   :  { %v704_v41 = vpop.f32.mrb[8].mxu1 }
 0x1f5   :  { %v705_v42 = vadd.f32 %v835_v40, %v704_v41  ;;  %v929_v43 = vpop.f32.mrb[9].mxu1 }
 0x1f6   :  { %v707_v44 = vpop.f32.mrb[10].mxu1 }
 0x1f7   :  { %v710_v45 = vmax.f32 %v705_v42, 0.0  ;;  %v930_v46 = vpop.f32.mrb[11].mxu1 }
 0x1f9   :  { %v711_v48 = vpack.c.bf16 %v710_v45, %v710_v45 }
 0x1fb   :  { %936 = vmatmul.mubr.msk.bf16.vlgmr.msra.gmra.mrb[12].mxu1 %vm666_vm2, %v711_v48 }
 0x2ce   :  { %v772_v49 = vpop.f32.mrb[12].mxu1 }
 0x2cf   :  { %v773_v50 = vadd.f32 %v839_v47, %v772_v49  ;;  %v937_v51 = vpop.f32.mrb[13].mxu1 }
 0x2d0   :  { %v775_v52 = vpop.f32.mrb[14].mxu1 }
 0x2d1   :  { %v778_v53 = vpack.c.bf16 %v773_v50, %v773_v50  ;;  %v938_v54 = vpop.f32.mrb[15].mxu1 }
 0x2d3   :  { %779 = vst [vmem:[%s1237_s7] sm:$0x1] %v778_v53 }

</bundles_post_ra>
